<compile_context>
chip_gen: v6e
topology: v6e:2x2x1
jax: 0.10.0
libtpu: 0.0.40
codegen_flags: <defaults>
</compile_context>

<pallas_src>
import functools

import numpy as np

import jax
import jax.numpy as jnp
from jax.experimental import pallas as pl
from jax.experimental.pallas import tpu as pltpu


# ------------------------------ helpers --------------------------------------

def _round_up(x, m):
    return ((x + m - 1) // m) * m


def _default_tuning():
    """(tile_m, vmem_limit_bytes) picked per TPU generation."""
    vmem_bytes = None
    try:
        info = pltpu.get_tpu_info()
        vmem_bytes = getattr(info, "vmem_capacity_bytes", None)
    except Exception:
        vmem_bytes = None
    if vmem_bytes is not None and vmem_bytes >= 96 * 1024 * 1024:
        # v5e / v6e: 128 MiB VMEM per TC -> bigger row tiles, generous limit.
        return 512, 100 * 1024 * 1024
    # v7x (64 MiB per TC) or unknown: conservative, leave compiler headroom.
    return 256, 48 * 1024 * 1024


# ------------------------------ kernel body -----------------------------------

def _make_output_kernel(eps, compute_dtype):
    """dense + bias + LayerNorm (no residual) on one (TILE_M, I) row tile."""

    def kernel(x_ref, w_ref, p_ref, o_ref):
        x = x_ref[...]                                    # (TILE_M, I)
        if compute_dtype is not None and x.dtype != compute_dtype:
            x = x.astype(compute_dtype)                   # per-tile cast only
        w = w_ref[...]                                    # (I, H) pre-cast, resident
        y = jnp.dot(x, w, preferred_element_type=jnp.float32)   # MXU, f32 acc

        params = p_ref[...].astype(jnp.float32)           # (3, H) f32
        bias = params[0:1, :]
        gamma = params[1:2, :]
        beta = params[2:3, :]

        y = y + bias                                       # (TILE_M, H), f32
        # LayerNorm (biased variance, eps inside rsqrt); elementwise math in f32
        # (v5e VPU/EUP have no bf16); rsqrt goes to the EUP slot.
        mu = jnp.mean(y, axis=-1, keepdims=True)
        d = y - mu
        var = jnp.mean(d * d, axis=-1, keepdims=True)
        yn = d * jax.lax.rsqrt(var + eps)
        o_ref[...] = (yn * gamma + beta).astype(o_ref.dtype)

    return kernel


# -------------------------------- wrapper -------------------------------------

def removed_rc_bert_output_pallas(hidden_states, input_tensor, w, b, gamma,
                                  beta, *, eps=1e-12, tile_m=None,
                                  compute_dtype=jnp.bfloat16,
                                  vmem_limit_bytes=None, out_dtype=None):
    """Equivalent of removedResidualConnectionBertOutput.forward.

    hidden_states: (B, S, intermediate_size)
    input_tensor:  (B, S, hidden_size) — ignored by the module (residual
                   connection removed; it is not added before LayerNorm).
    w:             (intermediate_size, hidden_size)  (pre-transposed vs torch)
    b, gamma, beta: (hidden_size,)
    compute_dtype: MXU operand dtype (default bf16; accumulation stays f32).
    """
    del input_tensor  # residual connection removed — not used in forward

    B, S, I = hidden_states.shape
    I_w, H = w.shape
    assert I_w == I, "weight shape mismatch"
    M = B * S

    default_tm, default_vmem = _default_tuning()
    if tile_m is None:
        tile_m = default_tm
    if vmem_limit_bytes is None:
        vmem_limit_bytes = default_vmem
    if out_dtype is None:
        out_dtype = hidden_states.dtype

    # Row tile: multiple of 8 sublanes, capped so that the "parallel" row axis
    # has >= 2 grid steps whenever possible (keeps both v7x TCs busy).
    tm = min(_round_up(tile_m, 8), _round_up(M, 8))
    if M > 8:
        tm = min(tm, _round_up(pl.cdiv(M, 2), 8))
    grid_m = pl.cdiv(M, tm)

    # Flatten in the wrapper (layout plumbing, no in-kernel reshape). No pad:
    # the ragged last block (if any) is masked by Pallas; rows are independent.
    x2 = hidden_states.reshape(M, I)

    # Pre-cast the weight ONCE here (not per grid step inside the kernel);
    # halves its HBM fetch and VMEM residency when compute_dtype=bf16.
    w_c = w.astype(compute_dtype) if compute_dtype is not None else w

    # Pack bias / gamma / beta into a single (3, H) f32 block (LN math is f32).
    params = jnp.stack([b, gamma, beta], axis=0).astype(jnp.float32)

    kernel = _make_output_kernel(eps, compute_dtype)

    cost = pl.CostEstimate(
        flops=2 * M * I * H,
        transcendentals=M,                                  # one rsqrt per row
        bytes_accessed=(M * I * x2.dtype.itemsize
                        + I * H * w_c.dtype.itemsize
                        + 3 * H * 4
                        + M * H * np.dtype(out_dtype).itemsize),
    )

    def build(constant_pipeline_mode):
        const_kw = ({"pipeline_mode": constant_pipeline_mode}
                    if constant_pipeline_mode is not None else {})
        return pl.pallas_call(
            kernel,
            out_shape=jax.ShapeDtypeStruct((M, H), out_dtype),
            grid_spec=pltpu.PrefetchScalarGridSpec(
                num_scalar_prefetch=0,
                grid=(grid_m,),
                in_specs=[
                    # activations: tiled over rows, pipelined/double-buffered
                    pl.BlockSpec((tm, I), lambda i: (i, 0)),
                    # weight & packed LN params: constant blocks, VMEM-resident
                    pl.BlockSpec((I, H), lambda i: (0, 0), **const_kw),
                    pl.BlockSpec((3, H), lambda i: (0, 0), **const_kw),
                ],
                out_specs=pl.BlockSpec((tm, H), lambda i: (i, 0)),
            ),
            compiler_params=pltpu.CompilerParams(
                dimension_semantics=("parallel",),   # shard rows across TCs
                vmem_limit_bytes=vmem_limit_bytes,
            ),
            cost_estimate=cost,
        )

    try:
        # Single-buffer the constant blocks (they never change across the grid).
        out2 = build(pl.Buffered(1))(x2, w_c, params)
    except Exception:
        # TODO(synk): drop this fallback once pl.Buffered(1) on constant
        # blocks is confirmed supported by the deployed jax/Mosaic version.
        out2 = build(None)(x2, w_c, params)

    return out2.reshape(B, S, H)


# --------------------------- pure-JAX reference --------------------------------

def _ref_removed_rc_bert_output(hidden_states, input_tensor, w, b, gamma, beta,
                                eps=1e-12, compute_dtype=None):
    del input_tensor  # module ignores it (no residual connection)
    x = hidden_states
    if compute_dtype is not None:
        x = x.astype(compute_dtype)
        w = w.astype(compute_dtype)
    y = jnp.dot(x, w, preferred_element_type=jnp.float32) + b   # dense (+ bias)
    # dropout = identity (eval)
    mu = jnp.mean(y, axis=-1, keepdims=True)
    var = jnp.mean((y - mu) ** 2, axis=-1, keepdims=True)
    out = (y - mu) * jax.lax.rsqrt(var + eps) * gamma + beta
    return out.astype(hidden_states.dtype)


# ----------------------------------- main ---------------------------------------

if __name__ == "__main__":
    # Small shapes consistent with the module: batch=2, seq=8,
    # intermediate_size=64, hidden_size=32.
    B, S, I, H = 2, 8, 64, 32

    key = jax.random.PRNGKey(0)
    k_x, k_res, k_w, k_b, k_g, k_be = jax.random.split(key, 6)

    hidden_states = jax.random.normal(k_x, (B, S, I), dtype=jnp.float32)
    input_tensor = jax.random.normal(k_res, (B, S, H), dtype=jnp.float32)

    w = (0.02 * jax.random.normal(k_w, (I, H))).astype(jnp.float32)
    b = (0.02 * jax.random.normal(k_b, (H,))).astype(jnp.float32)
    gamma = (1.0 + 0.1 * jax.random.normal(k_g, (H,))).astype(jnp.float32)
    beta = (0.1 * jax.random.normal(k_be, (H,))).astype(jnp.float32)

    # tile_m=8 exercises a 2-step "parallel" row grid even at toy shapes.
    out = removed_rc_bert_output_pallas(hidden_states, input_tensor,
                                        w, b, gamma, beta, tile_m=8)
    out = jax.block_until_ready(out)
    assert out.shape == (B, S, H)

    # Compare against a reference that uses the same bf16 MXU operands
    # (tight), and against the pure f32 reference (loose, bf16 rounding).
    ref_bf16 = _ref_removed_rc_bert_output(hidden_states, input_tensor, w, b,
                                           gamma, beta,
                                           compute_dtype=jnp.bfloat16)
    ref_f32 = _ref_removed_rc_bert_output(hidden_states, input_tensor, w, b,
                                          gamma, beta)
    assert jnp.allclose(out, ref_bf16, atol=1e-2, rtol=1e-2), \
        "mismatch vs bf16-operand JAX reference"
    assert jnp.allclose(out, ref_f32, atol=5e-2, rtol=5e-2), \
        "mismatch vs f32 JAX reference"

    print("KERNEL_OK")
</pallas_src>

<mosaic_0001>
module attributes {stable_mosaic.version = 11 : i64} {
  func.func @kernel(%arg0: i32, %arg1: memref<8x64xf32, #tpu.memory_space<vmem>>, %arg2: memref<64x32xbf16, #tpu.memory_space<vmem>>, %arg3: memref<3x32xf32, #tpu.memory_space<vmem>>, %arg4: memref<8x32xf32, #tpu.memory_space<vmem>>) attributes {dimension_semantics = [#tpu.dimension_semantics<parallel>], iteration_bounds = array<i64: 2>, scalar_prefetch = 0 : i64, scratch_operands = 0 : i64, tpu.core_type = #tpu.core_type<tc>, window_params = [{transform_indices = @transform_0, window_bounds = array<i64: 8, 64>}, {pipeline_mode = #tpu.pipeline_mode<synchronous>, transform_indices = @transform_1, window_bounds = array<i64: 64, 32>}, {pipeline_mode = #tpu.pipeline_mode<synchronous>, transform_indices = @transform_2, window_bounds = array<i64: 3, 32>}, {transform_indices = @transform_3, window_bounds = array<i64: 8, 32>}]} {
    %c0 = arith.constant 0 : index
    %c0_0 = arith.constant 0 : index
    %0 = vector.load %arg1[%c0, %c0_0] : memref<8x64xf32, #tpu.memory_space<vmem>>, vector<8x64xf32>
    %1 = arith.truncf %0 : vector<8x64xf32> to vector<8x64xbf16>
    %c0_1 = arith.constant 0 : index
    %c0_2 = arith.constant 0 : index
    %2 = vector.load %arg2[%c0_1, %c0_2] : memref<64x32xbf16, #tpu.memory_space<vmem>>, vector<64x32xbf16>
    %cst = arith.constant dense<0.000000e+00> : vector<8x32xf32>
    %3 = tpu.matmul %1, %2, %cst {dimension_numbers = #tpu.dot_dimension_numbers<[1], [0], [0], [1], [0, 0, 1, 1], [], []>} : vector<8x64xbf16>, vector<64x32xbf16>, vector<8x32xf32> -> vector<8x32xf32>
    %c0_3 = arith.constant 0 : index
    %c0_4 = arith.constant 0 : index
    %4 = vector.load %arg3[%c0_3, %c0_4] : memref<3x32xf32, #tpu.memory_space<vmem>>, vector<3x32xf32>
    %5 = vector.extract_strided_slice %4 {offsets = [0, 0], sizes = [1, 32], strides = [1, 1]} : vector<3x32xf32> to vector<1x32xf32>
    %6 = vector.extract_strided_slice %4 {offsets = [1, 0], sizes = [1, 32], strides = [1, 1]} : vector<3x32xf32> to vector<1x32xf32>
    %7 = vector.extract_strided_slice %4 {offsets = [2, 0], sizes = [1, 32], strides = [1, 1]} : vector<3x32xf32> to vector<1x32xf32>
    %8 = vector.broadcast %5 : vector<1x32xf32> to vector<8x32xf32>
    %9 = arith.addf %3, %8 : vector<8x32xf32>
    %cst_5 = arith.constant dense<0.000000e+00> : vector<8xf32>
    %10 = vector.multi_reduction <add>, %9, %cst_5 [1] : vector<8x32xf32> to vector<8xf32>
    %11 = vector.shape_cast %10 : vector<8xf32> to vector<8x1xf32>
    %cst_6 = arith.constant 3.200000e+01 : f32
    %12 = vector.broadcast %cst_6 : f32 to vector<8x1xf32>
    %13 = arith.divf %11, %12 : vector<8x1xf32>
    %14 = vector.broadcast %13 : vector<8x1xf32> to vector<8x32xf32>
    %15 = arith.subf %9, %14 : vector<8x32xf32>
    %16 = arith.mulf %15, %15 : vector<8x32xf32>
    %cst_7 = arith.constant dense<0.000000e+00> : vector<8xf32>
    %17 = vector.multi_reduction <add>, %16, %cst_7 [1] : vector<8x32xf32> to vector<8xf32>
    %18 = vector.shape_cast %17 : vector<8xf32> to vector<8x1xf32>
    %cst_8 = arith.constant 3.200000e+01 : f32
    %19 = vector.broadcast %cst_8 : f32 to vector<8x1xf32>
    %20 = arith.divf %18, %19 : vector<8x1xf32>
    %cst_9 = arith.constant 9.99999996E-13 : f32
    %21 = vector.broadcast %cst_9 : f32 to vector<8x1xf32>
    %22 = arith.addf %20, %21 : vector<8x1xf32>
    %23 = math.rsqrt %22 : vector<8x1xf32>
    %24 = vector.broadcast %23 : vector<8x1xf32> to vector<8x32xf32>
    %25 = arith.mulf %15, %24 : vector<8x32xf32>
    %26 = vector.broadcast %6 : vector<1x32xf32> to vector<8x32xf32>
    %27 = arith.mulf %25, %26 : vector<8x32xf32>
    %28 = vector.broadcast %7 : vector<1x32xf32> to vector<8x32xf32>
    %29 = arith.addf %27, %28 : vector<8x32xf32>
    %c0_10 = arith.constant 0 : index
    %c0_11 = arith.constant 0 : index
    %30 = vector.load %arg4[%c0_10, %c0_11] : memref<8x32xf32, #tpu.memory_space<vmem>>, vector<8x32xf32>
    tpu.vector_store %arg4[%c0_10, %c0_11], %29 {strides = array<i32>} : memref<8x32xf32, #tpu.memory_space<vmem>>, vector<8x32xf32>,
    return
  }
  func.func @transform_0(%arg0: i32) -> (i32, i32) {
    %c0_i32 = arith.constant 0 : i32
    %c0_i32_0 = arith.constant 0 : i32
    return %arg0, %c0_i32 : i32, i32
  }
  func.func @transform_1(%arg0: i32) -> (i32, i32) {
    %c0_i32 = arith.constant 0 : i32
    %c0_i32_0 = arith.constant 0 : i32
    %c0_i32_1 = arith.constant 0 : i32
    return %c0_i32, %c0_i32_0 : i32, i32
  }
  func.func @transform_2(%arg0: i32) -> (i32, i32) {
    %c0_i32 = arith.constant 0 : i32
    %c0_i32_0 = arith.constant 0 : i32
    %c0_i32_1 = arith.constant 0 : i32
    return %c0_i32, %c0_i32_0 : i32, i32
  }
  func.func @transform_3(%arg0: i32) -> (i32, i32) {
    %c0_i32 = arith.constant 0 : i32
    %c0_i32_0 = arith.constant 0 : i32
    return %arg0, %c0_i32 : i32, i32
  }
}

module attributes {stable_mosaic.version = 11 : i64} {
  func.func @kernel(%arg0: i32, %arg1: memref<8x64xf32, #tpu.memory_space<vmem>>, %arg2: memref<64x32xbf16, #tpu.memory_space<vmem>>, %arg3: memref<3x32xf32, #tpu.memory_space<vmem>>, %arg4: memref<8x32xf32, #tpu.memory_space<vmem>>) attributes {dimension_semantics = [#tpu.dimension_semantics<parallel>], iteration_bounds = array<i64: 2>, scalar_prefetch = 0 : i64, scratch_operands = 0 : i64, tpu.core_type = #tpu.core_type<tc>, window_params = [{transform_indices = @transform_0, window_bounds = array<i64: 8, 64>}, {pipeline_mode = #tpu.pipeline_mode<synchronous>, transform_indices = @transform_1, window_bounds = array<i64: 64, 32>}, {pipeline_mode = #tpu.pipeline_mode<synchronous>, transform_indices = @transform_2, window_bounds = array<i64: 3, 32>}, {transform_indices = @transform_3, window_bounds = array<i64: 8, 32>}]} {
    %c0 = arith.constant 0 : index
    %c0_0 = arith.constant 0 : index
    %0 = vector.load %arg1[%c0, %c0_0] : memref<8x64xf32, #tpu.memory_space<vmem>>, vector<8x64xf32>
    %1 = arith.truncf %0 : vector<8x64xf32> to vector<8x64xbf16>
    %c0_1 = arith.constant 0 : index
    %c0_2 = arith.constant 0 : index
    %2 = vector.load %arg2[%c0_1, %c0_2] : memref<64x32xbf16, #tpu.memory_space<vmem>>, vector<64x32xbf16>
    %cst = arith.constant dense<0.000000e+00> : vector<8x32xf32>
    %3 = tpu.matmul %1, %2, %cst {dimension_numbers = #tpu.dot_dimension_numbers<[1], [0], [0], [1], [0, 0, 1, 1], [], []>} : vector<8x64xbf16>, vector<64x32xbf16>, vector<8x32xf32> -> vector<8x32xf32>
    %c0_3 = arith.constant 0 : index
    %c0_4 = arith.constant 0 : index
    %4 = vector.load %arg3[%c0_3, %c0_4] : memref<3x32xf32, #tpu.memory_space<vmem>>, vector<3x32xf32>
    %5 = vector.extract_strided_slice %4 {offsets = [0, 0], sizes = [1, 32], strides = [1, 1]} : vector<3x32xf32> to vector<1x32xf32>
    %6 = vector.extract_strided_slice %4 {offsets = [1, 0], sizes = [1, 32], strides = [1, 1]} : vector<3x32xf32> to vector<1x32xf32>
    %7 = vector.extract_strided_slice %4 {offsets = [2, 0], sizes = [1, 32], strides = [1, 1]} : vector<3x32xf32> to vector<1x32xf32>
    %8 = vector.broadcast %5 : vector<1x32xf32> to vector<8x32xf32>
    %9 = arith.addf %3, %8 : vector<8x32xf32>
    %cst_5 = arith.constant dense<0.000000e+00> : vector<8xf32>
    %10 = vector.multi_reduction <add>, %9, %cst_5 [1] : vector<8x32xf32> to vector<8xf32>
    %11 = vector.shape_cast %10 : vector<8xf32> to vector<8x1xf32>
    %cst_6 = arith.constant 3.200000e+01 : f32
    %12 = vector.broadcast %cst_6 : f32 to vector<8x1xf32>
    %13 = arith.divf %11, %12 : vector<8x1xf32>
    %14 = vector.broadcast %13 : vector<8x1xf32> to vector<8x32xf32>
    %15 = arith.subf %9, %14 : vector<8x32xf32>
    %16 = arith.mulf %15, %15 : vector<8x32xf32>
    %cst_7 = arith.constant dense<0.000000e+00> : vector<8xf32>
    %17 = vector.multi_reduction <add>, %16, %cst_7 [1] : vector<8x32xf32> to vector<8xf32>
    %18 = vector.shape_cast %17 : vector<8xf32> to vector<8x1xf32>
    %cst_8 = arith.constant 3.200000e+01 : f32
    %19 = vector.broadcast %cst_8 : f32 to vector<8x1xf32>
    %20 = arith.divf %18, %19 : vector<8x1xf32>
    %cst_9 = arith.constant 9.99999996E-13 : f32
    %21 = vector.broadcast %cst_9 : f32 to vector<8x1xf32>
    %22 = arith.addf %20, %21 : vector<8x1xf32>
    %23 = math.rsqrt %22 : vector<8x1xf32>
    %24 = vector.broadcast %23 : vector<8x1xf32> to vector<8x32xf32>
    %25 = arith.mulf %15, %24 : vector<8x32xf32>
    %26 = vector.broadcast %6 : vector<1x32xf32> to vector<8x32xf32>
    %27 = arith.mulf %25, %26 : vector<8x32xf32>
    %28 = vector.broadcast %7 : vector<1x32xf32> to vector<8x32xf32>
    %29 = arith.addf %27, %28 : vector<8x32xf32>
    %c0_10 = arith.constant 0 : index
    %c0_11 = arith.constant 0 : index
    %30 = vector.load %arg4[%c0_10, %c0_11] : memref<8x32xf32, #tpu.memory_space<vmem>>, vector<8x32xf32>
    tpu.vector_store %arg4[%c0_10, %c0_11], %29 {strides = array<i32>} : memref<8x32xf32, #tpu.memory_space<vmem>>, vector<8x32xf32>,
    return
  }
  func.func @transform_0(%arg0: i32) -> (i32, i32) {
    %c0_i32 = arith.constant 0 : i32
    %c0_i32_0 = arith.constant 0 : i32
    return %arg0, %c0_i32 : i32, i32
  }
  func.func @transform_1(%arg0: i32) -> (i32, i32) {
    %c0_i32 = arith.constant 0 : i32
    %c0_i32_0 = arith.constant 0 : i32
    %c0_i32_1 = arith.constant 0 : i32
    return %c0_i32, %c0_i32_0 : i32, i32
  }
  func.func @transform_2(%arg0: i32) -> (i32, i32) {
    %c0_i32 = arith.constant 0 : i32
    %c0_i32_0 = arith.constant 0 : i32
    %c0_i32_1 = arith.constant 0 : i32
    return %c0_i32, %c0_i32_0 : i32, i32
  }
  func.func @transform_3(%arg0: i32) -> (i32, i32) {
    %c0_i32 = arith.constant 0 : i32
    %c0_i32_0 = arith.constant 0 : i32
    return %arg0, %c0_i32 : i32, i32
  }
}

</mosaic_0001>

<bundles_post_ra>
// kernel: tpu_custom_call.1
= control target key start
LH: loop header
LB: loop body
LE: loop exit
PB: predicated region body
PF: predicated region fallthrough
CT: control target
= control target key end

     0   :  { %8 = vsyncpa [#allocation3], 0  ;;  %s618_s0 = inlined_call_operand.vmem [shape: f32[16,64], index: 0, kind: input, shape index: {}]   ;;  %s619_s1 = inlined_call_operand.vmem [shape: bf16[64,32], index: 1, kind: input, shape index: {}]   ;;  %s620_s2 = inlined_call_operand.vmem [shape: f32[3,32], index: 2, kind: input, shape index: {}]   ;;  %s621_s3 = inlined_call_operand.hbm [shape: f32[16,32], index: 3, kind: output, shape index: {}]  }
   0x1   :  { %10 = vsyncpa [#allocation3 + $0x1], 0  ;;  %s513_s12 = smov 0   ;;  %s515_s13 = smov 0  }
   0x2   :  { %s517_s14 = smov 0   ;;  %s519_s15 = smov 0  }
   0x3 LB: > { %s534_s16 = sadd.s32 4294967295, %s488_s15   ;;  %s349_s17 = sadd.s32 4294967294, %s488_s15   ;;  %s488_s15 = sphi %s519_s15, %s627_s15   ;;  %s484_s14 = sphi %s517_s14, %s626_s14   ;;  %s480_s13 = sphi %s515_s13, %s625_s13   ;;  %s476_s12 = sphi %s513_s12, %s624_s12  }
   0x4   : > { %s538_s18 = sadd.s32 1, %s488_s15   ;;  %s91_s19 = sadd.s32 1, %s484_s14 }
   0x5   : > { %s88_s20 = ssub.s32 %s488_s15, %s538_s18  ;;  %p101_p0 = scmp.ne.s32.totalorder %s484_s14, %s480_s13 }
   0x6   : > { %p89_p1 = scmp.eq.s32.totalorder %s88_s20, 0  ;;  %p102_p2 = scmp.eq.s32.totalorder %s534_s16, 1 }
   0x7   : > { %p107_p3 = scmp.ne.s32.totalorder %s480_s13, %s476_s12  ;;  %p108_p4 = scmp.eq.s32.totalorder %s349_s17, 1 }
   0x8   : > { %s549_s21 = scalar_select %p89_p1, %s484_s14, %s91_s19  }
   0x9   : > { %p551_p5 = por %p102_p2, %p101_p0  ;;  %p555_p6 = por %p108_p4, %p107_p3 }
   0xa   : > { %p352_p7 = scmp.ge.s32.totalorder %s488_s15, 1  ;;  %p139_p8 = scmp.lt.s32.totalorder %s488_s15, 3 }
   0xc   : > { %p140_p9 = pnand %p352_p7, %p139_p8 }
   0xd   : > { %p162_p10 = scmp.lt.s32.totalorder (!%p140_p9), %s534_s16, 1  ;;  %s159_s17 = sand.u32 (!%p140_p9), 1, %s480_s13  }
   0xe   : > { %143 = sbr.rel (%p140_p9) target bundleno = 552 (0x228), region = 32  ;;  %s353_s19 = sshll.u32 (!%p140_p9), %s159_s17, 3 }
   0xf   : > { %s361_s20 = sshll.u32 (!%p140_p9), %s534_s16, 7  ;;  %s161_s24 = scalar_lea.vmem (!%p140_p9), [#allocation2], %s353_s19 }
  0x10   : > { %s290_s25 = sshll.u32 (!%p140_p9), %s161_s24, 4  ;;  %s277_s29 = scalar_lea.sflag (!%p140_p9), [#allocation3], %s159_s17  ;;  %s291_s25 = int_to_ptr.vmem [resolvable:$true] %s290_s25 }
  0x11   : > { %s428_s30 = scalar_lea.vmem (!%p140_p9), %s291_s25, 128 }
  0x12   : > { %p429_p11 = scmp.ne.s32.totalorder (!%p140_p9), %s291_s25, %s428_s30 }
  0x13   : > { %v422_v0 = vld [vmem:[%s619_s1 + $0x18] sm:$0xff]   ;;  %v490_v1 = vmov 0.0   ;;  %v423_v2 = vld [vmem:[%s619_s1 + $0x10] sm:$0xff]   ;;  %vm491_vm0 = vmmov 0   ;;  %s163_s28 = scalar_select %p162_p10, %s534_s16, 1  ;;  %v424_v3 = vld [vmem:[%s619_s1 + $0x8] sm:$0xff]   ;;  %v178_v7 = vlaneseq }
  0x14   : > { %369 = vmatprep.subr.bf16.mxu0 %v490_v1  ;;  %377 = vmatprep.mubr.msk.bf16.mxu0 %vm491_vm0, %v490_v1  ;;  %v425_v4 = vld [vmem:[%s619_s1] sm:$0xff]   ;;  %vm206_vm1 = vcmask 523264   ;;  %vm250_vm2 = vcmask 261120   ;;  %p430_p12 = pnand %p429_p11, %p551_p5 }
  0x15   : > { %370 = vmatpush3.bf16.msra.mxu0 %v422_v0  ;;  %s354_s4 = sshll.u32 %s163_s28, 3  ;;  %v179_v8 = vshrl.u32 %v178_v7, 7  ;;  %v177_v10 = vld [vmem:[%s620_s2] sm:$0x7]  ;;  %s288_s28 = scalar_lea.hbm %s621_s3, %s361_s20 }
  0x16   : > { %371 = vmatprep.subr.bf16.mxu0 %v490_v1  ;;  %s165_s7 = scalar_lea.vmem %s618_s0, %s354_s4  ;;  %p431_p13 = pneg %p430_p12 }
  0x17   : > { %v167_v5 = vld [vmem:[%s165_s7] sm:$0xff]  ;;  %v180_v9 = vsub.s32 0, %v179_v8  ;;  %v267_v26 = vsub.s32 1, %v179_v8  ;;  %v272_v27 = vsub.s32 2, %v179_v8  ;;  %s492_s4 = smov [#allocation2]  }
  0x18   : > { %v168_v6 = vpack.c.bf16 %v167_v5, %v167_v5  ;;  %s432_s5 = sshll.u32 %s492_s4, 4  ;;  %s433_s5 = int_to_ptr.vmem [resolvable:$false] %s432_s5 }
  0x19   : > { %372 = vmatpush3.bf16.msra.mxu0 %v423_v2  ;;  %v181_v11 = vrot.slane %v177_v10, %v180_v9  ;;  %v268_v28 = vrot.slane %v177_v10, %v267_v26  ;;  %v273_v30 = vrot.slane %v177_v10, %v272_v27  ;;  %s434_s16 = scalar_lea.vmem %s433_s5, 256  ;;  %p435_p0 = scmp.lt.s32.totalorder %s291_s25, %s433_s5 }
  0x1a   : > { %373 = vmatprep.subr.bf16.mxu0 %v490_v1  ;;  %p436_p1 = scmp.lt.s32.totalorder %s434_s16, %s428_s30 }
  0x1c   : > { %p437_p2 = por %p436_p1, %p435_p0 }
  0x1d   : > { %374 = vmatpush3.bf16.msra.mxu0 %v424_v3 }
  0x1e   : > { %375 = vmatprep.subr.bf16.mxu0 %v490_v1  ;;  %p438_p3 = pnand %p437_p2, %p431_p13 }
  0x21   : > { %376 = vmatpush3.bf16.msra.mxu0 %v425_v4 }
  0x24   : > { %378 = vmatmul.mubr.msk.bf16.vlgmr.msra.gmra.mxu0 %vm206_vm1, %v168_v6 }
  0xe4   : > { %v244_v12 = vpop.f32.mrf.mxu0 }
  0xe5   : > { %v245_v13 = vadd.f32 %v244_v12, %v181_v11 }
  0xe6   : > { %v379_v14 = vpop.f32.mrf.mxu0 }
  0xe7   : > { %v251_v15 = vsel %vm250_vm2, %v245_v13, 0.0 }
  0xe8   : > { %252 = vadd.xlane.f32.xlu0 %v251_v15  ;;  %v247_v16 = vpop.f32.mrf.mxu0 }
  0xea   : > { %v380_v17 = vpop.f32.mrf.mxu0 }
 0x171   : > { %v253_v18 = vpop.xlane.xlu0 %252 }
 0x172   : > { %v255_v19 = vmul.f32 0.03125, %v253_v18 }
 0x174   : > { %v256_v20 = vsub.f32 %v245_v13, %v255_v19 }
 0x176   : > { %v257_v21 = vmul.f32 %v256_v20, %v256_v20 }
 0x178   : > { %v258_v22 = vsel %vm250_vm2, %v257_v21, 0.0 }
 0x179   : > { %259 = vadd.xlane.f32.xlu0 %v258_v22 }
 0x202   : > { %v260_v23 = vpop.xlane.xlu0 %259 }
 0x203   : > { %v261_v24 = vmul.f32 0.03125, %v260_v23 }
 0x205   : > { %v262_v25 = vadd.f32 1e-12, %v261_v24 }
 0x207   : > { %426 = vrsqrt.f32 %v262_v25 }
 0x214   : > { %v427_v29 = vpop.eup %426 }
 0x215   : > { %v264_v31 = vmul.f32 %v427_v29, %v256_v20 }
 0x217   : > { %v269_v32 = vmul.f32 %v268_v28, %v264_v31 }
 0x219   : > { %v274_v33 = vadd.f32 %v273_v30, %v269_v32 }
 0x21b   : > { %275 = vst.msk [vmem:[%s161_s24] sm:$0xff] %vm250_vm2, %v274_v33 }
 0x21c   : > { %441 = shalt.err (!%p438_p3)
}
 0x21d   : > { %s442_s6 = scalar_lea.hbm %s288_s28, 128  ;;  %s446_s9 = scalar_lea.hbm %s621_s3, 256 }
 0x21e   : > { %p443_p4 = scmp.ne.s32.totalorder %s288_s28, %s442_s6  ;;  %p447_p9 = scmp.lt.s32.totalorder %s288_s28, %s621_s3 }
 0x21f   : > { %p448_p10 = scmp.lt.s32.totalorder %s446_s9, %s442_s6 }
 0x220   : > { %p444_p7 = pnand %p443_p4, %p551_p5 }
 0x221   : > { %p449_p11 = por %p448_p10, %p447_p9 }
 0x222   : > { %p445_p8 = pneg %p444_p7 }
 0x224   : > { %p450_p12 = pnand %p449_p11, %p445_p8 }
 0x226   : > { %453 = shalt.err (!%p450_p12)
}
 0x227   : > { %381 = dma.vmem_to_hbm [thread:$0]  (%p551_p5), %s291_s25, 128, %s288_s28, %s277_s29  }
 0x228 PF: > { %p387_p13 = scmp.ge.s32.totalorder %s488_s15, 2  ;;  %s302_s17 = sand.u32 1, %s476_s12  }
 0x229   : > { %s303_s19 = scalar_lea.sflag [#allocation3], %s302_s17 }
 0x22a   : > { %p384_p0 = pnand %p387_p13, %p555_p6 }
 0x22c   : > { %p385_p1 = pneg %p384_p0 }
 0x22e   : > { %471 = dma.done.wait (%p385_p1), %s303_s19, 128  }
 0x22f   : > { %473 = vsyncadd (%p385_p1), %s303_s19, 4294967168  ;;  %p13_p2 = scmp.ge.s32.totalorder %s538_s18, 4   ;;  %s624_s12 = smov %s480_s13 }
 0x230   : > { %s625_s13 = smov %s484_s14  ;;  %s626_s14 = smov %s549_s21 }
 0x231   : > { %s627_s15 = smov %s538_s18  ;;  %15 = sbr.rel (!%p13_p2) target bundleno = 3 (0x3), region = 67 }
 0x236   :  { %308 = vsyncpa [#allocation3], 1 }
 0x237   :  { %310 = vsyncpa [#allocation3 + $0x1], 1 }

// kernel: tpu_custom_call.1
= control target key start
LH: loop header
LB: loop body
LE: loop exit
PB: predicated region body
PF: predicated region fallthrough
CT: control target
= control target key end

     0   :  { %8 = vsyncpa [#allocation3], 0  ;;  %s618_s0 = inlined_call_operand.vmem [shape: f32[16,64], index: 0, kind: input, shape index: {}]   ;;  %s619_s1 = inlined_call_operand.vmem [shape: bf16[64,32], index: 1, kind: input, shape index: {}]   ;;  %s620_s2 = inlined_call_operand.vmem [shape: f32[3,32], index: 2, kind: input, shape index: {}]   ;;  %s621_s3 = inlined_call_operand.hbm [shape: f32[16,32], index: 3, kind: output, shape index: {}]  }
   0x1   :  { %10 = vsyncpa [#allocation3 + $0x1], 0  ;;  %s513_s12 = smov 0   ;;  %s515_s13 = smov 0  }
   0x2   :  { %s517_s14 = smov 0   ;;  %s519_s15 = smov 0  }
   0x3 LB: > { %s534_s16 = sadd.s32 4294967295, %s488_s15   ;;  %s349_s17 = sadd.s32 4294967294, %s488_s15   ;;  %s488_s15 = sphi %s519_s15, %s627_s15   ;;  %s484_s14 = sphi %s517_s14, %s626_s14   ;;  %s480_s13 = sphi %s515_s13, %s625_s13   ;;  %s476_s12 = sphi %s513_s12, %s624_s12  }
   0x4   : > { %s538_s18 = sadd.s32 1, %s488_s15   ;;  %s91_s19 = sadd.s32 1, %s484_s14 }
   0x5   : > { %s88_s20 = ssub.s32 %s488_s15, %s538_s18  ;;  %p101_p0 = scmp.ne.s32.totalorder %s484_s14, %s480_s13 }
   0x6   : > { %p89_p1 = scmp.eq.s32.totalorder %s88_s20, 0  ;;  %p102_p2 = scmp.eq.s32.totalorder %s534_s16, 1 }
   0x7   : > { %p107_p3 = scmp.ne.s32.totalorder %s480_s13, %s476_s12  ;;  %p108_p4 = scmp.eq.s32.totalorder %s349_s17, 1 }
   0x8   : > { %s549_s21 = scalar_select %p89_p1, %s484_s14, %s91_s19  }
   0x9   : > { %p551_p5 = por %p102_p2, %p101_p0  ;;  %p555_p6 = por %p108_p4, %p107_p3 }
   0xa   : > { %p352_p7 = scmp.ge.s32.totalorder %s488_s15, 1  ;;  %p139_p8 = scmp.lt.s32.totalorder %s488_s15, 3 }
   0xc   : > { %p140_p9 = pnand %p352_p7, %p139_p8 }
   0xd   : > { %p162_p10 = scmp.lt.s32.totalorder (!%p140_p9), %s534_s16, 1  ;;  %s159_s17 = sand.u32 (!%p140_p9), 1, %s480_s13  }
   0xe   : > { %143 = sbr.rel (%p140_p9) target bundleno = 552 (0x228), region = 32  ;;  %s353_s19 = sshll.u32 (!%p140_p9), %s159_s17, 3 }
   0xf   : > { %s361_s20 = sshll.u32 (!%p140_p9), %s534_s16, 7  ;;  %s161_s24 = scalar_lea.vmem (!%p140_p9), [#allocation2], %s353_s19 }
  0x10   : > { %s290_s25 = sshll.u32 (!%p140_p9), %s161_s24, 4  ;;  %s277_s29 = scalar_lea.sflag (!%p140_p9), [#allocation3], %s159_s17  ;;  %s291_s25 = int_to_ptr.vmem [resolvable:$true] %s290_s25 }
  0x11   : > { %s428_s30 = scalar_lea.vmem (!%p140_p9), %s291_s25, 128 }
  0x12   : > { %p429_p11 = scmp.ne.s32.totalorder (!%p140_p9), %s291_s25, %s428_s30 }
  0x13   : > { %v422_v0 = vld [vmem:[%s619_s1 + $0x18] sm:$0xff]   ;;  %v490_v1 = vmov 0.0   ;;  %v423_v2 = vld [vmem:[%s619_s1 + $0x10] sm:$0xff]   ;;  %vm491_vm0 = vmmov 0   ;;  %s163_s28 = scalar_select %p162_p10, %s534_s16, 1  ;;  %v424_v3 = vld [vmem:[%s619_s1 + $0x8] sm:$0xff]   ;;  %v178_v7 = vlaneseq }
  0x14   : > { %369 = vmatprep.subr.bf16.mxu0 %v490_v1  ;;  %377 = vmatprep.mubr.msk.bf16.mxu0 %vm491_vm0, %v490_v1  ;;  %v425_v4 = vld [vmem:[%s619_s1] sm:$0xff]   ;;  %vm206_vm1 = vcmask 523264   ;;  %vm250_vm2 = vcmask 261120   ;;  %p430_p12 = pnand %p429_p11, %p551_p5 }
  0x15   : > { %370 = vmatpush3.bf16.msra.mxu0 %v422_v0  ;;  %s354_s4 = sshll.u32 %s163_s28, 3  ;;  %v179_v8 = vshrl.u32 %v178_v7, 7  ;;  %v177_v10 = vld [vmem:[%s620_s2] sm:$0x7]  ;;  %s288_s28 = scalar_lea.hbm %s621_s3, %s361_s20 }
  0x16   : > { %371 = vmatprep.subr.bf16.mxu0 %v490_v1  ;;  %s165_s7 = scalar_lea.vmem %s618_s0, %s354_s4  ;;  %p431_p13 = pneg %p430_p12 }
  0x17   : > { %v167_v5 = vld [vmem:[%s165_s7] sm:$0xff]  ;;  %v180_v9 = vsub.s32 0, %v179_v8  ;;  %v267_v26 = vsub.s32 1, %v179_v8  ;;  %v272_v27 = vsub.s32 2, %v179_v8  ;;  %s492_s4 = smov [#allocation2]  }
  0x18   : > { %v168_v6 = vpack.c.bf16 %v167_v5, %v167_v5  ;;  %s432_s5 = sshll.u32 %s492_s4, 4  ;;  %s433_s5 = int_to_ptr.vmem [resolvable:$false] %s432_s5 }
  0x19   : > { %372 = vmatpush3.bf16.msra.mxu0 %v423_v2  ;;  %v181_v11 = vrot.slane %v177_v10, %v180_v9  ;;  %v268_v28 = vrot.slane %v177_v10, %v267_v26  ;;  %v273_v30 = vrot.slane %v177_v10, %v272_v27  ;;  %s434_s16 = scalar_lea.vmem %s433_s5, 256  ;;  %p435_p0 = scmp.lt.s32.totalorder %s291_s25, %s433_s5 }
  0x1a   : > { %373 = vmatprep.subr.bf16.mxu0 %v490_v1  ;;  %p436_p1 = scmp.lt.s32.totalorder %s434_s16, %s428_s30 }
  0x1c   : > { %p437_p2 = por %p436_p1, %p435_p0 }
  0x1d   : > { %374 = vmatpush3.bf16.msra.mxu0 %v424_v3 }
  0x1e   : > { %375 = vmatprep.subr.bf16.mxu0 %v490_v1  ;;  %p438_p3 = pnand %p437_p2, %p431_p13 }
  0x21   : > { %376 = vmatpush3.bf16.msra.mxu0 %v425_v4 }
  0x24   : > { %378 = vmatmul.mubr.msk.bf16.vlgmr.msra.gmra.mxu0 %vm206_vm1, %v168_v6 }
  0xe4   : > { %v244_v12 = vpop.f32.mrf.mxu0 }
  0xe5   : > { %v245_v13 = vadd.f32 %v244_v12, %v181_v11 }
  0xe6   : > { %v379_v14 = vpop.f32.mrf.mxu0 }
  0xe7   : > { %v251_v15 = vsel %vm250_vm2, %v245_v13, 0.0 }
  0xe8   : > { %252 = vadd.xlane.f32.xlu0 %v251_v15  ;;  %v247_v16 = vpop.f32.mrf.mxu0 }
  0xea   : > { %v380_v17 = vpop.f32.mrf.mxu0 }
 0x171   : > { %v253_v18 = vpop.xlane.xlu0 %252 }
 0x172   : > { %v255_v19 = vmul.f32 0.03125, %v253_v18 }
 0x174   : > { %v256_v20 = vsub.f32 %v245_v13, %v255_v19 }
 0x176   : > { %v257_v21 = vmul.f32 %v256_v20, %v256_v20 }
 0x178   : > { %v258_v22 = vsel %vm250_vm2, %v257_v21, 0.0 }
 0x179   : > { %259 = vadd.xlane.f32.xlu0 %v258_v22 }
 0x202   : > { %v260_v23 = vpop.xlane.xlu0 %259 }
 0x203   : > { %v261_v24 = vmul.f32 0.03125, %v260_v23 }
 0x205   : > { %v262_v25 = vadd.f32 1e-12, %v261_v24 }
 0x207   : > { %426 = vrsqrt.f32 %v262_v25 }
 0x214   : > { %v427_v29 = vpop.eup %426 }
 0x215   : > { %v264_v31 = vmul.f32 %v427_v29, %v256_v20 }
 0x217   : > { %v269_v32 = vmul.f32 %v268_v28, %v264_v31 }
 0x219   : > { %v274_v33 = vadd.f32 %v273_v30, %v269_v32 }
 0x21b   : > { %275 = vst.msk [vmem:[%s161_s24] sm:$0xff] %vm250_vm2, %v274_v33 }
 0x21c   : > { %441 = shalt.err (!%p438_p3)
}
 0x21d   : > { %s442_s6 = scalar_lea.hbm %s288_s28, 128  ;;  %s446_s9 = scalar_lea.hbm %s621_s3, 256 }
 0x21e   : > { %p443_p4 = scmp.ne.s32.totalorder %s288_s28, %s442_s6  ;;  %p447_p9 = scmp.lt.s32.totalorder %s288_s28, %s621_s3 }
 0x21f   : > { %p448_p10 = scmp.lt.s32.totalorder %s446_s9, %s442_s6 }
 0x220   : > { %p444_p7 = pnand %p443_p4, %p551_p5 }
 0x221   : > { %p449_p11 = por %p448_p10, %p447_p9 }
 0x222   : > { %p445_p8 = pneg %p444_p7 }
 0x224   : > { %p450_p12 = pnand %p449_p11, %p445_p8 }
 0x226   : > { %453 = shalt.err (!%p450_p12)
}
 0x227   : > { %381 = dma.vmem_to_hbm [thread:$0]  (%p551_p5), %s291_s25, 128, %s288_s28, %s277_s29  }
 0x228 PF: > { %p387_p13 = scmp.ge.s32.totalorder %s488_s15, 2  ;;  %s302_s17 = sand.u32 1, %s476_s12  }
 0x229   : > { %s303_s19 = scalar_lea.sflag [#allocation3], %s302_s17 }
 0x22a   : > { %p384_p0 = pnand %p387_p13, %p555_p6 }
 0x22c   : > { %p385_p1 = pneg %p384_p0 }
 0x22e   : > { %471 = dma.done.wait (%p385_p1), %s303_s19, 128  }
 0x22f   : > { %473 = vsyncadd (%p385_p1), %s303_s19, 4294967168  ;;  %p13_p2 = scmp.ge.s32.totalorder %s538_s18, 4   ;;  %s624_s12 = smov %s480_s13 }
 0x230   : > { %s625_s13 = smov %s484_s14  ;;  %s626_s14 = smov %s549_s21 }
 0x231   : > { %s627_s15 = smov %s538_s18  ;;  %15 = sbr.rel (!%p13_p2) target bundleno = 3 (0x3), region = 67 }
 0x236   :  { %308 = vsyncpa [#allocation3], 1 }
 0x237   :  { %310 = vsyncpa [#allocation3 + $0x1], 1 }

</bundles_post_ra>
